<compile_context>
chip_gen: v6e
topology: v6e:2x2x1
jax: 0.10.0
libtpu: 0.0.40
codegen_flags: <defaults>
</compile_context>

<pallas_src>
import functools
from math import sqrt

import jax
import jax.numpy as jnp
import numpy as np
from jax.experimental import pallas as pl
from jax.experimental.pallas import tpu as pltpu


# ----------------------------------------------------------------------------
# Pallas kernel: one block of `batch_block` batch elements per grid step.
# ----------------------------------------------------------------------------
def _clustered_attention_kernel(oh_t_ref, oh_ref, scale_ref, q_ref, kt_ref,
                                v_ref, mask_d_ref, o_ref, *, batch_block):
    # Static head-block-diagonal value mask; constant index_map keeps this tiny
    # block resident across grid steps (no re-DMA, no per-step iota/divide).
    mask_d = mask_d_ref[0]                                    # (HC, HD) 0/1

    def body(b, carry):
        oh_t = oh_t_ref[b]       # (HC, L)  membership^T (0/1, bf16)
        oh = oh_ref[b]           # (L, HC)  membership   (0/1, bf16)
        scale = scale_ref[b]     # (HC, HE) f32: softmax_temp/count on the own
                                 #          head's E-block, 0 elsewhere
        q = q_ref[b]             # (L, HE)
        kt = kt_ref[b]           # (HE, S)  keys pre-transposed in the wrapper
        v = v_ref[b]             # (S, HD)

        # _GroupQueries: per-(head, cluster) centroid; temp/count + head mask
        # are folded into `scale` (0 rows for empty clusters).
        agg = jnp.dot(oh_t, q, preferred_element_type=jnp.float32)      # (HC,HE)
        q_grouped = (agg * scale).astype(q.dtype)

        # Centroid attention scores (softmax_temp already folded in).
        scores = jnp.dot(q_grouped, kt,
                         preferred_element_type=jnp.float32)            # (HC,S)
        s_max = jnp.max(scores, axis=-1, keepdims=True)
        p = jnp.exp(scores - s_max)
        denom = jnp.sum(p, axis=-1, keepdims=True)
        attn = (p * pl.reciprocal(denom, approx=True)).astype(v.dtype)  # (HC,S)
        # attention dropout is identity in eval mode.

        v_grouped = jnp.dot(attn, v, preferred_element_type=jnp.float32)  # (HC,HD)
        v_grouped = (v_grouped * mask_d).astype(v.dtype)

        # _BroadcastValues: every query copies its own head/cluster value.
        out = jnp.dot(oh, v_grouped, preferred_element_type=jnp.float32)  # (L,HD)
        o_ref[b] = out.astype(o_ref.dtype)
        return carry

    jax.lax.fori_loop(0, batch_block, body, 0, unroll=True)


def _vmem_limit_bytes():
    """Generation-aware scoped-VMEM limit (v7x: 64 MiB physical; v5e/v6e: 128)."""
    cap = 64 << 20  # conservative fallback
    try:
        info = pltpu.get_tpu_info()
        cap = int(getattr(info, "vmem_capacity_bytes", cap))
    except Exception:
        pass
    return (48 << 20) if cap <= (64 << 20) else (96 << 20)


def _pick_batch_block(n, block_bytes_per_elem, scratch_bytes_per_elem,
                      vmem_limit):
    """Largest divisor of n such that a grid step moves ~2 MiB of DMA, the
    double-buffered blocks + f32 intermediates stay within ~half the VMEM
    budget, and the grid keeps >= 2 parallel steps when n >= 2."""
    denom = 2 * block_bytes_per_elem + scratch_bytes_per_elem
    cap = max(1, (vmem_limit // 2) // max(denom, 1))
    target = max(1, (2 << 20) // max(block_bytes_per_elem, 1))
    want = max(1, min(cap, target, n))
    if n >= 2:
        want = min(want, max(1, n // 2))
    for b in range(want, 0, -1):
        if n % b == 0:
            return b
    return 1


def clustered_attention_pallas(onehot_t, onehot, scale_e, q2, kt, v2, mask_d):
    """onehot_t: (N, HC, L), onehot: (N, L, HC) 0/1 in q dtype;
    scale_e: (N, HC, HE) f32; q2: (N, L, HE); kt: (N, HE, S); v2: (N, S, HD);
    mask_d: (1, HC, HD).  Returns (N, L, HD) in q2.dtype."""
    N, L, HE = q2.shape
    S = kt.shape[2]
    HD = v2.shape[2]
    HC = onehot.shape[2]

    # Lane-dense output stores (sub-128 lane widths -> masked vst.msk, ~4.5x).
    # TODO(synk): pad HE/HD to multiples of 128 instead of asserting.
    assert HE % 128 == 0 and HD % 128 == 0, (
        "clustered_attention_pallas requires H*E and H*D to be multiples of 128")

    itemsize = jnp.dtype(q2.dtype).itemsize
    block_bytes = ((2 * L * HC + L * HE + HE * S + S * HD + L * HD) * itemsize
                   + HC * HE * 4)
    scratch_bytes = 4 * (HC * HE + 2 * HC * S + HC * HD + L * HD)
    vmem_limit = _vmem_limit_bytes()
    B = _pick_batch_block(N, block_bytes, scratch_bytes, vmem_limit)
    grid = (N // B,)

    kernel = functools.partial(_clustered_attention_kernel, batch_block=B)

    flops = 2 * N * (HC * L * HE + HC * HE * S + HC * S * HD + L * HC * HD)
    bytes_accessed = (N * block_bytes + N * L * HD * itemsize
                      + HC * HD * itemsize)
    cost = pl.CostEstimate(flops=int(flops), transcendentals=int(N * HC * S),
                           bytes_accessed=int(bytes_accessed))

    return pl.pallas_call(
        kernel,
        out_shape=jax.ShapeDtypeStruct((N, L, HD), q2.dtype),
        grid_spec=pltpu.PrefetchScalarGridSpec(
            num_scalar_prefetch=0,
            grid=grid,
            in_specs=[
                pl.BlockSpec((B, HC, L), lambda n: (n, 0, 0)),   # onehot^T
                pl.BlockSpec((B, L, HC), lambda n: (n, 0, 0)),   # onehot
                pl.BlockSpec((B, HC, HE), lambda n: (n, 0, 0)),  # scale (f32)
                pl.BlockSpec((B, L, HE), lambda n: (n, 0, 0)),   # q
                pl.BlockSpec((B, HE, S), lambda n: (n, 0, 0)),   # k^T
                pl.BlockSpec((B, S, HD), lambda n: (n, 0, 0)),   # v
                pl.BlockSpec((1, HC, HD), lambda n: (0, 0, 0)),  # mask_d (resident)
            ],
            out_specs=pl.BlockSpec((B, L, HD), lambda n: (n, 0, 0)),
        ),
        compiler_params=pltpu.CompilerParams(
            dimension_semantics=("parallel",),
            vmem_limit_bytes=vmem_limit),
        cost_estimate=cost,
    )(onehot_t, onehot, scale_e, q2, kt, v2, mask_d)


# ----------------------------------------------------------------------------
# Plain-JAX glue: LSH hashing + Lloyd k-means in Hamming space.
# ----------------------------------------------------------------------------
def compute_hashes(q_flat, planes):
    """q_flat: (B, E) f32, planes: (bits, E+1) (hash_bias=True: last col = bias)."""
    E = q_flat.shape[-1]
    bits = planes.shape[0]
    proj = q_flat @ planes[:, :E].T + planes[None, :, E]              # (B, bits)
    powers = jnp.left_shift(jnp.uint32(1), jnp.arange(bits, dtype=jnp.uint32))
    return jnp.sum((proj > 0).astype(jnp.uint32) * powers, axis=-1,
                   dtype=jnp.uint32)                                  # (B,)


def hamming_kmeans(hashes, num_clusters, iterations, bits):
    """hashes: (NH, L) uint32 -> (assignments (NH, L) int32, counts (NH, C) f32).

    Lloyd iterations with Hamming distance; centroids re-estimated by per-bit
    majority vote."""
    # TODO(synk): centroid initialisation / tie-breaking may differ from the
    # fast_transformers CUDA `cluster()` kernel; the attention math downstream
    # is identical for any cluster assignment.
    NH, L = hashes.shape
    C = num_clusters
    bitpos = jnp.arange(bits, dtype=jnp.uint32)
    centroids = hashes[:, (jnp.arange(C) * L) // C]                   # (NH, C)
    hbits = (jnp.right_shift(hashes[:, :, None], bitpos)
             & jnp.uint32(1)).astype(jnp.float32)                     # (NH, L, bits)

    def assign_fn(cents):
        d = jax.lax.population_count(
            jnp.bitwise_xor(hashes[:, :, None], cents[:, None, :]))   # (NH, L, C)
        return jnp.argmin(d, axis=-1).astype(jnp.int32)

    for _ in range(iterations):
        assign = assign_fn(centroids)
        onehot = jax.nn.one_hot(assign, C, dtype=jnp.float32)         # (NH, L, C)
        counts = jnp.sum(onehot, axis=1)                              # (NH, C)
        bitsums = jnp.einsum('nlc,nlb->ncb', onehot, hbits)           # (NH, C, bits)
        maj = (2.0 * bitsums > counts[..., None]).astype(jnp.uint32)
        new_centroids = jnp.sum(jnp.left_shift(maj, bitpos), axis=-1,
                                dtype=jnp.uint32)
        centroids = jnp.where(counts > 0, new_centroids, centroids)

    assign = assign_fn(centroids)
    counts = jnp.sum(jax.nn.one_hot(assign, C, dtype=jnp.float32), axis=1)
    return assign, counts


def make_query_groups(queries, planes, num_clusters, iterations, bits):
    """queries: (N, L, H, E) -> (assignments (N, H, L) int32, counts (N, H, C))."""
    N, L, H, E = queries.shape
    hashes = compute_hashes(queries.reshape(N * L * H, E).astype(jnp.float32),
                            planes)
    hashes = jnp.transpose(hashes.reshape(N, L, H), (0, 2, 1)).reshape(N * H, L)
    assign, counts = hamming_kmeans(hashes, num_clusters, iterations, bits)
    return assign.reshape(N, H, L), counts.reshape(N, H, num_clusters)


def clustered_attention_forward(queries, keys, values, planes, groups=None, *,
                                num_clusters, iterations=10, bits=32,
                                softmax_temp=None):
    """Equivalent of ClusteredAttention.forward in eval mode (dropout = id).

    queries: (N, L, H, E), keys: (N, S, H, E), values: (N, S, H, D);
    returns (N, L, H, D) in the input dtype."""
    N, L, H, E = queries.shape
    S = keys.shape[1]
    D = values.shape[3]
    C = num_clusters
    HC, HE, HD = H * C, H * E, H * D
    temp = float(softmax_temp) if softmax_temp is not None else 1.0 / sqrt(E)

    if groups is None:
        groups = make_query_groups(queries, planes, C, iterations, bits)
    assign, counts = groups                               # (N, H, L), (N, H, C)

    # Dense cluster-membership one-hot (head-major last axis) built once here,
    # so the kernel DMAs a dense slab instead of rebuilding it from lane-sparse
    # ids every grid step; the transpose makes both one-hot matmuls natural.
    cl_flat = (assign.astype(jnp.int32)
               + (jnp.arange(H, dtype=jnp.int32) * C)[None, :, None])  # (N, H, L)
    cl_t = jnp.transpose(cl_flat, (0, 2, 1))                           # (N, L, H)
    onehot = jnp.sum(jax.nn.one_hot(cl_t, HC, dtype=jnp.float32), axis=2)
    onehot = onehot.astype(queries.dtype)                              # (N, L, HC)
    onehot_t = jnp.transpose(onehot, (0, 2, 1))                        # (N, HC, L)

    # softmax_temp / cluster-count folded with the head-block-diagonal E-mask
    # into one dense f32 scale matrix (0 rows for empty clusters).
    head_row = jnp.arange(HC, dtype=jnp.int32) // C
    mask_e = (head_row[:, None] == (jnp.arange(HE, dtype=jnp.int32) // E)[None, :])
    inv = jnp.where(counts > 0, temp / jnp.maximum(counts, 1.0), 0.0)  # (N, H, C)
    scale_e = (inv.reshape(N, HC, 1).astype(jnp.float32)
               * mask_e.astype(jnp.float32)[None])                     # (N, HC, HE)

    # Static head-block-diagonal D-mask (stays resident in VMEM in the kernel).
    mask_d = (head_row[:, None] == (jnp.arange(HD, dtype=jnp.int32) // D)[None, :])
    mask_d = mask_d.astype(queries.dtype)[None]                        # (1, HC, HD)

    # q/v: free metadata-only reshapes of the native (N, L, H, E) layout; keys
    # are transposed once here so the in-kernel scores matmul needs no relayout.
    q2 = queries.reshape(N, L, HE)
    kt = jnp.transpose(keys.reshape(N, S, HE), (0, 2, 1))              # (N, HE, S)
    v2 = values.reshape(N, S, HD)

    out = clustered_attention_pallas(onehot_t, onehot, scale_e, q2, kt, v2,
                                     mask_d)
    return out.reshape(N, L, H, D)                                     # free reshape


# ----------------------------------------------------------------------------
# Pure-JAX reference (f32 math) for validation of the bf16 Pallas path.
# ----------------------------------------------------------------------------
def _reference(queries, keys, values, assign, counts, temp):
    C = counts.shape[-1]
    q = jnp.transpose(queries.astype(jnp.float32), (0, 2, 1, 3))
    k = jnp.transpose(keys.astype(jnp.float32), (0, 2, 1, 3))
    v = jnp.transpose(values.astype(jnp.float32), (0, 2, 1, 3))
    onehot = jax.nn.one_hot(assign, C, dtype=jnp.float32)             # (N,H,L,C)
    inv = jnp.where(counts > 0, 1.0 / jnp.maximum(counts, 1.0), 0.0)
    qg = jnp.einsum('nhlc,nhle->nhce', onehot, q) * inv[..., None]
    A = jax.nn.softmax(temp * jnp.einsum('nhce,nhse->nhcs', qg, k), axis=-1)
    vg = jnp.einsum('nhcs,nhsd->nhcd', A, v)
    out = jnp.einsum('nhlc,nhcd->nhld', onehot, vg)
    return jnp.transpose(out, (0, 2, 1, 3))                           # (N,L,H,D)


if __name__ == "__main__":
    key = jax.random.PRNGKey(0)
    # N=4 so the batch-blocking picks B_blk=2 and the sub-batch loop is exercised.
    N, H, L, S, E, D = 4, 4, 128, 128, 32, 32                         # H*E = H*D = 128
    num_clusters, iterations, bits = 8, 10, 32

    kq, kk, kv, kp = jax.random.split(key, 4)
    queries = jax.random.normal(kq, (N, L, H, E), jnp.float32).astype(jnp.bfloat16)
    keys_ = jax.random.normal(kk, (N, S, H, E), jnp.float32).astype(jnp.bfloat16)
    values = jax.random.normal(kv, (N, S, H, D), jnp.float32).astype(jnp.bfloat16)
    # deterministic stand-in for torch.nn.init.normal_(planes), shape (bits, E+1)
    planes = jax.random.normal(kp, (bits, E + 1), dtype=jnp.float32)

    # compute the clustering once and feed the same groups to kernel + reference
    groups = make_query_groups(queries, planes, num_clusters, iterations, bits)

    fwd = jax.jit(functools.partial(clustered_attention_forward,
                                    num_clusters=num_clusters,
                                    iterations=iterations, bits=bits))
    out = fwd(queries, keys_, values, planes, groups)
    out = jax.block_until_ready(out)
    assert out.shape == (N, L, H, D)
    assert out.dtype == queries.dtype

    assign, counts = groups
    ref = _reference(queries, keys_, values, assign, counts, 1.0 / sqrt(E))
    np.testing.assert_allclose(np.asarray(out.astype(jnp.float32)),
                               np.asarray(ref), rtol=2e-2, atol=2e-2)

    print("KERNEL_OK")
</pallas_src>

<mosaic_0001>
module attributes {stable_mosaic.version = 11 : i64} {
  func.func @_clustered_attention_kernel(%arg0: i32, %arg1: memref<2x32x128xbf16, #tpu.memory_space<vmem>>, %arg2: memref<2x128x32xbf16, #tpu.memory_space<vmem>>, %arg3: memref<2x32x128xf32, #tpu.memory_space<vmem>>, %arg4: memref<2x128x128xbf16, #tpu.memory_space<vmem>>, %arg5: memref<2x128x128xbf16, #tpu.memory_space<vmem>>, %arg6: memref<2x128x128xbf16, #tpu.memory_space<vmem>>, %arg7: memref<1x32x128xbf16, #tpu.memory_space<vmem>>, %arg8: memref<2x128x128xbf16, #tpu.memory_space<vmem>>) attributes {dimension_semantics = [#tpu.dimension_semantics<parallel>], iteration_bounds = array<i64: 2>, scalar_prefetch = 0 : i64, scratch_operands = 0 : i64, tpu.core_type = #tpu.core_type<tc>, window_params = [{transform_indices = @transform_0, window_bounds = array<i64: 2, 32, 128>}, {transform_indices = @transform_1, window_bounds = array<i64: 2, 128, 32>}, {transform_indices = @transform_2, window_bounds = array<i64: 2, 32, 128>}, {transform_indices = @transform_3, window_bounds = array<i64: 2, 128, 128>}, {transform_indices = @transform_4, window_bounds = array<i64: 2, 128, 128>}, {transform_indices = @transform_5, window_bounds = array<i64: 2, 128, 128>}, {pipeline_mode = #tpu.pipeline_mode<synchronous>, transform_indices = @transform_6, window_bounds = array<i64: 1, 32, 128>}, {transform_indices = @transform_7, window_bounds = array<i64: 2, 128, 128>}]} {
    %c0 = arith.constant 0 : index
    %c0_0 = arith.constant 0 : index
    %c0_1 = arith.constant 0 : index
    %0 = vector.load %arg7[%c0, %c0_0, %c0_1] : memref<1x32x128xbf16, #tpu.memory_space<vmem>>, vector<1x32x128xbf16>
    %1 = vector.shape_cast %0 : vector<1x32x128xbf16> to vector<32x128xbf16>
    %c0_i32 = arith.constant 0 : i32
    %2 = arith.index_cast %c0_i32 : i32 to index
    %c0_2 = arith.constant 0 : index
    %c0_3 = arith.constant 0 : index
    %3 = vector.load %arg1[%2, %c0_2, %c0_3] : memref<2x32x128xbf16, #tpu.memory_space<vmem>>, vector<1x32x128xbf16>
    %4 = vector.shape_cast %3 : vector<1x32x128xbf16> to vector<32x128xbf16>
    %5 = arith.index_cast %c0_i32 : i32 to index
    %c0_4 = arith.constant 0 : index
    %c0_5 = arith.constant 0 : index
    %6 = vector.load %arg2[%5, %c0_4, %c0_5] : memref<2x128x32xbf16, #tpu.memory_space<vmem>>, vector<1x128x32xbf16>
    %7 = vector.shape_cast %6 : vector<1x128x32xbf16> to vector<128x32xbf16>
    %8 = arith.index_cast %c0_i32 : i32 to index
    %c0_6 = arith.constant 0 : index
    %c0_7 = arith.constant 0 : index
    %9 = vector.load %arg3[%8, %c0_6, %c0_7] : memref<2x32x128xf32, #tpu.memory_space<vmem>>, vector<1x32x128xf32>
    %10 = vector.shape_cast %9 : vector<1x32x128xf32> to vector<32x128xf32>
    %11 = arith.index_cast %c0_i32 : i32 to index
    %c0_8 = arith.constant 0 : index
    %c0_9 = arith.constant 0 : index
    %12 = vector.load %arg4[%11, %c0_8, %c0_9] : memref<2x128x128xbf16, #tpu.memory_space<vmem>>, vector<1x128x128xbf16>
    %13 = vector.shape_cast %12 : vector<1x128x128xbf16> to vector<128x128xbf16>
    %14 = arith.index_cast %c0_i32 : i32 to index
    %c0_10 = arith.constant 0 : index
    %c0_11 = arith.constant 0 : index
    %15 = vector.load %arg5[%14, %c0_10, %c0_11] : memref<2x128x128xbf16, #tpu.memory_space<vmem>>, vector<1x128x128xbf16>
    %16 = vector.shape_cast %15 : vector<1x128x128xbf16> to vector<128x128xbf16>
    %17 = arith.index_cast %c0_i32 : i32 to index
    %c0_12 = arith.constant 0 : index
    %c0_13 = arith.constant 0 : index
    %18 = vector.load %arg6[%17, %c0_12, %c0_13] : memref<2x128x128xbf16, #tpu.memory_space<vmem>>, vector<1x128x128xbf16>
    %19 = vector.shape_cast %18 : vector<1x128x128xbf16> to vector<128x128xbf16>
    %cst = arith.constant dense<0.000000e+00> : vector<32x128xf32>
    %20 = tpu.matmul %4, %13, %cst {dimension_numbers = #tpu.dot_dimension_numbers<[1], [0], [0], [1], [0, 0, 1, 1], [], []>} : vector<32x128xbf16>, vector<128x128xbf16>, vector<32x128xf32> -> vector<32x128xf32>
    %21 = arith.mulf %20, %10 : vector<32x128xf32>
    %22 = arith.truncf %21 : vector<32x128xf32> to vector<32x128xbf16>
    %cst_14 = arith.constant dense<0.000000e+00> : vector<32x128xf32>
    %23 = tpu.matmul %22, %16, %cst_14 {dimension_numbers = #tpu.dot_dimension_numbers<[1], [0], [0], [1], [0, 0, 1, 1], [], []>} : vector<32x128xbf16>, vector<128x128xbf16>, vector<32x128xf32> -> vector<32x128xf32>
    %cst_15 = arith.constant dense<0xFF800000> : vector<32xf32>
    %24 = vector.multi_reduction <maximumf>, %23, %cst_15 [1] : vector<32x128xf32> to vector<32xf32>
    %25 = vector.shape_cast %24 : vector<32xf32> to vector<32x1xf32>
    %26 = vector.broadcast %25 : vector<32x1xf32> to vector<32x128xf32>
    %27 = arith.subf %23, %26 : vector<32x128xf32>
    %28 = math.exp %27 : vector<32x128xf32>
    %cst_16 = arith.constant dense<0.000000e+00> : vector<32xf32>
    %29 = vector.multi_reduction <add>, %28, %cst_16 [1] : vector<32x128xf32> to vector<32xf32>
    %30 = vector.shape_cast %29 : vector<32xf32> to vector<32x1xf32>
    %31 = tpu.reciprocal %30 {approx = true} : vector<32x1xf32> -> vector<32x1xf32>
    %32 = vector.broadcast %31 : vector<32x1xf32> to vector<32x128xf32>
    %33 = arith.mulf %28, %32 : vector<32x128xf32>
    %34 = arith.truncf %33 : vector<32x128xf32> to vector<32x128xbf16>
    %cst_17 = arith.constant dense<0.000000e+00> : vector<32x128xf32>
    %35 = tpu.matmul %34, %19, %cst_17 {dimension_numbers = #tpu.dot_dimension_numbers<[1], [0], [0], [1], [0, 0, 1, 1], [], []>} : vector<32x128xbf16>, vector<128x128xbf16>, vector<32x128xf32> -> vector<32x128xf32>
    %36 = arith.extf %1 : vector<32x128xbf16> to vector<32x128xf32>
    %37 = arith.mulf %35, %36 : vector<32x128xf32>
    %38 = arith.truncf %37 : vector<32x128xf32> to vector<32x128xbf16>
    %cst_18 = arith.constant dense<0.000000e+00> : vector<128x128xf32>
    %39 = tpu.matmul %7, %38, %cst_18 {dimension_numbers = #tpu.dot_dimension_numbers<[1], [0], [0], [1], [0, 0, 1, 1], [], []>} : vector<128x32xbf16>, vector<32x128xbf16>, vector<128x128xf32> -> vector<128x128xf32>
    %40 = arith.truncf %39 : vector<128x128xf32> to vector<128x128xbf16>
    %41 = arith.index_cast %c0_i32 : i32 to index
    %c0_19 = arith.constant 0 : index
    %c0_20 = arith.constant 0 : index
    %42 = vector.load %arg8[%41, %c0_19, %c0_20] : memref<2x128x128xbf16, #tpu.memory_space<vmem>>, vector<1x128x128xbf16>
    %43 = vector.shape_cast %42 : vector<1x128x128xbf16> to vector<128x128xbf16>
    %44 = vector.shape_cast %40 : vector<128x128xbf16> to vector<1x128x128xbf16>
    tpu.vector_store %arg8[%41, %c0_19, %c0_20], %44 {strides = array<i32>} : memref<2x128x128xbf16, #tpu.memory_space<vmem>>, vector<1x128x128xbf16>,
    %c1_i32 = arith.constant 1 : i32
    %45 = arith.index_cast %c1_i32 : i32 to index
    %c0_21 = arith.constant 0 : index
    %c0_22 = arith.constant 0 : index
    %46 = vector.load %arg1[%45, %c0_21, %c0_22] : memref<2x32x128xbf16, #tpu.memory_space<vmem>>, vector<1x32x128xbf16>
    %47 = vector.shape_cast %46 : vector<1x32x128xbf16> to vector<32x128xbf16>
    %48 = arith.index_cast %c1_i32 : i32 to index
    %c0_23 = arith.constant 0 : index
    %c0_24 = arith.constant 0 : index
    %49 = vector.load %arg2[%48, %c0_23, %c0_24] : memref<2x128x32xbf16, #tpu.memory_space<vmem>>, vector<1x128x32xbf16>
    %50 = vector.shape_cast %49 : vector<1x128x32xbf16> to vector<128x32xbf16>
    %51 = arith.index_cast %c1_i32 : i32 to index
    %c0_25 = arith.constant 0 : index
    %c0_26 = arith.constant 0 : index
    %52 = vector.load %arg3[%51, %c0_25, %c0_26] : memref<2x32x128xf32, #tpu.memory_space<vmem>>, vector<1x32x128xf32>
    %53 = vector.shape_cast %52 : vector<1x32x128xf32> to vector<32x128xf32>
    %54 = arith.index_cast %c1_i32 : i32 to index
    %c0_27 = arith.constant 0 : index
    %c0_28 = arith.constant 0 : index
    %55 = vector.load %arg4[%54, %c0_27, %c0_28] : memref<2x128x128xbf16, #tpu.memory_space<vmem>>, vector<1x128x128xbf16>
    %56 = vector.shape_cast %55 : vector<1x128x128xbf16> to vector<128x128xbf16>
    %57 = arith.index_cast %c1_i32 : i32 to index
    %c0_29 = arith.constant 0 : index
    %c0_30 = arith.constant 0 : index
    %58 = vector.load %arg5[%57, %c0_29, %c0_30] : memref<2x128x128xbf16, #tpu.memory_space<vmem>>, vector<1x128x128xbf16>
    %59 = vector.shape_cast %58 : vector<1x128x128xbf16> to vector<128x128xbf16>
    %60 = arith.index_cast %c1_i32 : i32 to index
    %c0_31 = arith.constant 0 : index
    %c0_32 = arith.constant 0 : index
    %61 = vector.load %arg6[%60, %c0_31, %c0_32] : memref<2x128x128xbf16, #tpu.memory_space<vmem>>, vector<1x128x128xbf16>
    %62 = vector.shape_cast %61 : vector<1x128x128xbf16> to vector<128x128xbf16>
    %cst_33 = arith.constant dense<0.000000e+00> : vector<32x128xf32>
    %63 = tpu.matmul %47, %56, %cst_33 {dimension_numbers = #tpu.dot_dimension_numbers<[1], [0], [0], [1], [0, 0, 1, 1], [], []>} : vector<32x128xbf16>, vector<128x128xbf16>, vector<32x128xf32> -> vector<32x128xf32>
    %64 = arith.mulf %63, %53 : vector<32x128xf32>
    %65 = arith.truncf %64 : vector<32x128xf32> to vector<32x128xbf16>
    %cst_34 = arith.constant dense<0.000000e+00> : vector<32x128xf32>
    %66 = tpu.matmul %65, %59, %cst_34 {dimension_numbers = #tpu.dot_dimension_numbers<[1], [0], [0], [1], [0, 0, 1, 1], [], []>} : vector<32x128xbf16>, vector<128x128xbf16>, vector<32x128xf32> -> vector<32x128xf32>
    %cst_35 = arith.constant dense<0xFF800000> : vector<32xf32>
    %67 = vector.multi_reduction <maximumf>, %66, %cst_35 [1] : vector<32x128xf32> to vector<32xf32>
    %68 = vector.shape_cast %67 : vector<32xf32> to vector<32x1xf32>
    %69 = vector.broadcast %68 : vector<32x1xf32> to vector<32x128xf32>
    %70 = arith.subf %66, %69 : vector<32x128xf32>
    %71 = math.exp %70 : vector<32x128xf32>
    %cst_36 = arith.constant dense<0.000000e+00> : vector<32xf32>
    %72 = vector.multi_reduction <add>, %71, %cst_36 [1] : vector<32x128xf32> to vector<32xf32>
    %73 = vector.shape_cast %72 : vector<32xf32> to vector<32x1xf32>
    %74 = tpu.reciprocal %73 {approx = true} : vector<32x1xf32> -> vector<32x1xf32>
    %75 = vector.broadcast %74 : vector<32x1xf32> to vector<32x128xf32>
    %76 = arith.mulf %71, %75 : vector<32x128xf32>
    %77 = arith.truncf %76 : vector<32x128xf32> to vector<32x128xbf16>
    %cst_37 = arith.constant dense<0.000000e+00> : vector<32x128xf32>
    %78 = tpu.matmul %77, %62, %cst_37 {dimension_numbers = #tpu.dot_dimension_numbers<[1], [0], [0], [1], [0, 0, 1, 1], [], []>} : vector<32x128xbf16>, vector<128x128xbf16>, vector<32x128xf32> -> vector<32x128xf32>
    %79 = arith.extf %1 : vector<32x128xbf16> to vector<32x128xf32>
    %80 = arith.mulf %78, %79 : vector<32x128xf32>
    %81 = arith.truncf %80 : vector<32x128xf32> to vector<32x128xbf16>
    %cst_38 = arith.constant dense<0.000000e+00> : vector<128x128xf32>
    %82 = tpu.matmul %50, %81, %cst_38 {dimension_numbers = #tpu.dot_dimension_numbers<[1], [0], [0], [1], [0, 0, 1, 1], [], []>} : vector<128x32xbf16>, vector<32x128xbf16>, vector<128x128xf32> -> vector<128x128xf32>
    %83 = arith.truncf %82 : vector<128x128xf32> to vector<128x128xbf16>
    %84 = arith.index_cast %c1_i32 : i32 to index
    %c0_39 = arith.constant 0 : index
    %c0_40 = arith.constant 0 : index
    %85 = vector.load %arg8[%84, %c0_39, %c0_40] : memref<2x128x128xbf16, #tpu.memory_space<vmem>>, vector<1x128x128xbf16>
    %86 = vector.shape_cast %85 : vector<1x128x128xbf16> to vector<128x128xbf16>
    %87 = vector.shape_cast %83 : vector<128x128xbf16> to vector<1x128x128xbf16>
    tpu.vector_store %arg8[%84, %c0_39, %c0_40], %87 {strides = array<i32>} : memref<2x128x128xbf16, #tpu.memory_space<vmem>>, vector<1x128x128xbf16>,
    %c2_i32 = arith.constant 2 : i32
    return
  }
  func.func @transform_0(%arg0: i32) -> (i32, i32, i32) {
    %c0_i32 = arith.constant 0 : i32
    %c0_i32_0 = arith.constant 0 : i32
    %c0_i32_1 = arith.constant 0 : i32
    return %arg0, %c0_i32, %c0_i32_0 : i32, i32, i32
  }
  func.func @transform_1(%arg0: i32) -> (i32, i32, i32) {
    %c0_i32 = arith.constant 0 : i32
    %c0_i32_0 = arith.constant 0 : i32
    %c0_i32_1 = arith.constant 0 : i32
    return %arg0, %c0_i32, %c0_i32_0 : i32, i32, i32
  }
  func.func @transform_2(%arg0: i32) -> (i32, i32, i32) {
    %c0_i32 = arith.constant 0 : i32
    %c0_i32_0 = arith.constant 0 : i32
    %c0_i32_1 = arith.constant 0 : i32
    return %arg0, %c0_i32, %c0_i32_0 : i32, i32, i32
  }
  func.func @transform_3(%arg0: i32) -> (i32, i32, i32) {
    %c0_i32 = arith.constant 0 : i32
    %c0_i32_0 = arith.constant 0 : i32
    %c0_i32_1 = arith.constant 0 : i32
    return %arg0, %c0_i32, %c0_i32_0 : i32, i32, i32
  }
  func.func @transform_4(%arg0: i32) -> (i32, i32, i32) {
    %c0_i32 = arith.constant 0 : i32
    %c0_i32_0 = arith.constant 0 : i32
    %c0_i32_1 = arith.constant 0 : i32
    return %arg0, %c0_i32, %c0_i32_0 : i32, i32, i32
  }
  func.func @transform_5(%arg0: i32) -> (i32, i32, i32) {
    %c0_i32 = arith.constant 0 : i32
    %c0_i32_0 = arith.constant 0 : i32
    %c0_i32_1 = arith.constant 0 : i32
    return %arg0, %c0_i32, %c0_i32_0 : i32, i32, i32
  }
  func.func @transform_6(%arg0: i32) -> (i32, i32, i32) {
    %c0_i32 = arith.constant 0 : i32
    %c0_i32_0 = arith.constant 0 : i32
    %c0_i32_1 = arith.constant 0 : i32
    %c0_i32_2 = arith.constant 0 : i32
    return %c0_i32, %c0_i32_0, %c0_i32_1 : i32, i32, i32
  }
  func.func @transform_7(%arg0: i32) -> (i32, i32, i32) {
    %c0_i32 = arith.constant 0 : i32
    %c0_i32_0 = arith.constant 0 : i32
    %c0_i32_1 = arith.constant 0 : i32
    return %arg0, %c0_i32, %c0_i32_0 : i32, i32, i32
  }
}

</mosaic_0001>

<bundles_post_ra>
// kernel: mul.10
= control target key start
LH: loop header
LB: loop body
LE: loop exit
PB: predicated region body
PF: predicated region fallthrough
CT: control target
= control target key end

     0   :  { %vm22_vm0 = vcmask 64512   ;;  %s59_s14 = smov 8   ;;  %s60_s15 = smov 16   ;;  %vm28_vm1 = vcmask 261312   ;;  %vm34_vm2 = vcmask 195712   ;;  %vm40_vm3 = vcmask 130112   ;;  %s86_s0 = inlined_call_operand.vmem [shape: f32[4,4,8], index: 0, kind: input, shape index: {}]   ;;  %s87_s1 = inlined_call_operand.vmem [shape: f32[4,32], index: 1, kind: output, shape index: {}]  }
   0x1   :  { %v52_v0 = vld [vmem:[%s86_s0 + $0xc] sm:$0xf]  ;;  %v53_v1 = vld [vmem:[%s86_s0 + $0x8] sm:$0xf]  ;;  %v54_v2 = vld [vmem:[%s86_s0 + $0x4] sm:$0xf] }
   0x2   :  { %9 = vst [vmem:[#allocation1 + $0x18] sm:$0xf] %v52_v0  ;;  %14 = vst [vmem:[#allocation1 + $0x10] sm:$0xf] %v53_v1  ;;  %v19_v3 = vld [vmem:[%s86_s0] sm:$0xf] }
   0x3   :  { %18 = vst [vmem:[#allocation1 + $0x8] sm:$0xf] %v54_v2  ;;  %20 = vst [vmem:[#allocation1] sm:$0xf] %v19_v3  ;;  %s58_s0 = smov 24  }
   0xa   :  { %v25_v4 = vld [vmem:[#allocation1 + $0x3] ss:$8 sm:$0xf]   ;;  %v37_v5 = vld [vmem:[#allocation1 + $0x1] ss:$8 sm:$0xf]  }
   0xb   :  { %26 = vrot.lane.b32.xlu0 %v25_v4, %s58_s0  ;;  %v21_v6 = vld [vmem:[#allocation1] ss:$8 sm:$0xf]   ;;  %v31_v7 = vld [vmem:[#allocation1 + $0x2] ss:$8 sm:$0xf]   ;;  %38 = vrot.lane.b32.xlu1 %v37_v5, %s59_s14 }
   0xc   :  { %23 = vst.msk [vmem:[#allocation0] sm:$0xf] %vm22_vm0, %v21_v6  }
   0xf   :  { %32 = vrot.lane.b32.xlu0 %v31_v7, %s60_s15 }
  0x7d   :  { %v27_v8 = vpop.permute.xlu0 %26   ;;  %v39_v9 = vpop.permute.xlu1 %38  }
  0x7e   :  { %29 = vst.msk [vmem:[#allocation0] sm:$0xf] %vm28_vm1, %v27_v8  }
  0x81   :  { %v33_v10 = vpop.permute.xlu0 %32  }
  0x82   :  { %35 = vst.msk [vmem:[#allocation0] sm:$0xf] %vm34_vm2, %v33_v10  }
  0x83   :  { %41 = vst.msk [vmem:[#allocation0] sm:$0xf] %vm40_vm3, %v39_v9  }
  0x8a   :  { %v46_v11 = vld [vmem:[#allocation0] sm:$0xf] }
  0x8b   :  { %49 = vst [vmem:[%s87_s1] sm:$0xf] %v46_v11 }

// kernel: clustered_attention_forward.1
= control target key start
LH: loop header
LB: loop body
LE: loop exit
PB: predicated region body
PF: predicated region fallthrough
CT: control target
= control target key end

     0   :  { %s2654_s24 = smov 0   ;;  %s2850_s0 = inlined_call_operand.vmem [shape: bf16[4,32,128], index: 0, kind: input, shape index: {}]   ;;  %s2851_s1 = inlined_call_operand.vmem [shape: bf16[4,128,32], index: 1, kind: input, shape index: {}]   ;;  %s2852_s2 = inlined_call_operand.vmem [shape: f32[4,32,128], index: 2, kind: input, shape index: {}]   ;;  %s2853_s3 = inlined_call_operand.vmem [shape: bf16[4,128,128], index: 3, kind: input, shape index: {}]   ;;  %s2854_s4 = inlined_call_operand.vmem [shape: bf16[4,128,128], index: 4, kind: input, shape index: {}]   ;;  %s2855_s5 = inlined_call_operand.vmem [shape: bf16[4,128,128], index: 5, kind: input, shape index: {}]   ;;  %s2856_s6 = inlined_call_operand.vmem [shape: bf16[1,32,128], index: 6, kind: input, shape index: {}]   ;;  %s2857_s7 = inlined_call_operand.vmem [shape: bf16[4,128,128], index: 7, kind: output, shape index: {}]  }
   0x1 LB: > { %s1879_s25 = sadd.s32 4294967295, %s2612_s24   ;;  %p1883_p0 = scmp.ge.s32.totalorder %s2612_s24, 1  ;;  %s2612_s24 = sphi %s2654_s24, %s17_s24  }
   0x2   : > { %p299_p1 = scmp.lt.s32.totalorder %s2612_s24, 3 }
   0x4   : > { %p300_p2 = pnand %p1883_p0, %p299_p1 }
   0x5   : > { %s1884_s26 = sshll.u32 (!%p300_p2), %s1879_s25, 1 }
   0x6   : > { %303 = sbr.rel (%p300_p2) target bundleno = 2154 (0x86a), region = 48  ;;  %p364_p3 = scmp.lt.s32.totalorder (!%p300_p2), %s1884_s26, 3 }
   0xb   : > { %s2859_s26 = smov (!%p364_p3, %s1884_s26), 3  ;;  %vm886_vm0 = vcmask 261120  }
   0xc   : > { %s2665_s27 = sshll.u32 %s2859_s26, 6  ;;  %s2111_s8 = sshll.u32 %s2859_s26, 4 }
   0xd   : > { %s2671_s30 = scalar_lea.vmem %s2853_s3, %s2665_s27  ;;  %s2680_s11 = scalar_lea.vmem %s2850_s0, %s2111_s8 }
   0xe   : > { %v2506_v0 = vld [vmem:[%s2671_s30 + $0x38] sm:$0xff]   ;;  %v2507_v1 = vld [vmem:[%s2671_s30 + $0x30] sm:$0xff]   ;;  %v2508_v2 = vld [vmem:[%s2671_s30 + $0x28] sm:$0xff]   ;;  %s2687_s14 = scalar_lea.vmem %s2854_s4, %s2665_s27  ;;  %s2113_s15 = sshll.u32 %s2859_s26, 5 }
   0xf   : > { %2334 = vmatprep.subr.bf16.mxu0 %v2506_v0  ;;  %v2509_v3 = vld [vmem:[%s2671_s30 + $0x20] sm:$0xff]   ;;  %v2516_v5 = vld [vmem:[%s2687_s14 + $0x38] sm:$0xff]   ;;  %v2517_v6 = vld [vmem:[%s2687_s14 + $0x30] sm:$0xff]   ;;  %s2707_s18 = scalar_lea.vmem %s2852_s2, %s2113_s15  ;;  %s2717_s21 = scalar_lea.vmem %s2855_s5, %s2665_s27 }
  0x10   : > { %2335 = vmatpush3.bf16.msra.mxu0 %v2506_v0  ;;  %v2514_v4 = vld [vmem:[%s2680_s11] sm:$0xff]   ;;  %v2510_v7 = vld [vmem:[%s2671_s30 + $0x18] sm:$0xff]   ;;  %2354 = vmatprep.subr.bf16.mxu1 %v2516_v5  ;;  %v2518_v8 = vld [vmem:[%s2687_s14 + $0x28] sm:$0xff]   ;;  %s2731_s25 = scalar_lea.vmem %s2851_s1, %s2665_s27  ;;  %s2793_s10 = scalar_lea.vmem %s2857_s7, %s2665_s27 }
  0x11   : > { %2336 = vmatprep.subr.bf16.mxu0 %v2507_v1  ;;  %2350 = vmatprep.mubr.bf16.mxu0 %v2514_v4  ;;  %v2511_v9 = vld [vmem:[%s2671_s30 + $0x10] sm:$0xff]   ;;  %v2519_v10 = vld [vmem:[%s2687_s14 + $0x20] sm:$0xff]   ;;  %v2512_v11 = vld [vmem:[%s2671_s30 + $0x8] sm:$0xff]  }
  0x12   : > { %2355 = vmatpush3.bf16.msra.mxu1 %v2516_v5  ;;  %v2520_v12 = vld [vmem:[%s2687_s14 + $0x18] sm:$0xff]   ;;  %v2513_v13 = vld [vmem:[%s2671_s30] sm:$0xff]   ;;  %v2515_v14 = vld [vmem:[%s2680_s11 + $0x8] sm:$0xff]  }
  0x13   : > { %2356 = vmatprep.subr.bf16.mxu1 %v2517_v6  ;;  %v2521_v15 = vld [vmem:[%s2687_s14 + $0x10] sm:$0xff]   ;;  %v2522_v16 = vld [vmem:[%s2687_s14 + $0x8] sm:$0xff]   ;;  %v2523_v17 = vld [vmem:[%s2687_s14] sm:$0xff]  }
  0x14   : > { %2337 = vmatpush3.bf16.msra.mxu0 %v2507_v1  ;;  %v440_v20 = vld [vmem:[%s2707_s18 + $0x18] sm:$0xff]  ;;  %v437_v21 = vld [vmem:[%s2707_s18] sm:$0xff]  ;;  %v438_v23 = vld [vmem:[%s2707_s18 + $0x8] sm:$0xff] }
  0x15   : > { %2338 = vmatprep.subr.bf16.mxu0 %v2508_v2  ;;  %v439_v24 = vld [vmem:[%s2707_s18 + $0x10] sm:$0xff]  ;;  %v2524_v36 = vld [vmem:[%s2717_s21 + $0x38] sm:$0xff]   ;;  %v2526_v54 = vld [vmem:[%s2717_s21 + $0x28] sm:$0xff]  }
  0x16   : > { %2357 = vmatpush3.bf16.msra.mxu1 %v2517_v6  ;;  %v2525_v37 = vld [vmem:[%s2717_s21 + $0x30] sm:$0xff]   ;;  %v2527_v55 = vld [vmem:[%s2717_s21 + $0x20] sm:$0xff]   ;;  %v2528_v56 = vld [vmem:[%s2717_s21 + $0x18] sm:$0xff]  }
  0x17   : > { %2358 = vmatprep.subr.bf16.mxu1 %v2518_v8  ;;  %v2529_v57 = vld [vmem:[%s2717_s21 + $0x10] sm:$0xff]   ;;  %v2530_v58 = vld [vmem:[%s2717_s21 + $0x8] sm:$0xff]   ;;  %v2531_v59 = vld [vmem:[%s2717_s21] sm:$0xff]  }
  0x18   : > { %2339 = vmatpush3.bf16.msra.mxu0 %v2508_v2 }
  0x19   : > { %2340 = vmatprep.subr.bf16.mxu0 %v2509_v3 }
  0x1a   : > { %2359 = vmatpush3.bf16.msra.mxu1 %v2518_v8 }
  0x1b   : > { %2360 = vmatprep.subr.bf16.mxu1 %v2519_v10 }
  0x1c   : > { %2341 = vmatpush3.bf16.msra.mxu0 %v2509_v3 }
  0x1d   : > { %2342 = vmatprep.subr.bf16.mxu0 %v2510_v7 }
  0x1e   : > { %2361 = vmatpush3.bf16.msra.mxu1 %v2519_v10  ;;  %v2532_v10 = vld [vmem:[%s2731_s25] sm:$0xff]  }
  0x1f   : > { %2362 = vmatprep.subr.bf16.mxu1 %v2520_v12 }
  0x20   : > { %2343 = vmatpush3.bf16.msra.mxu0 %v2510_v7 }
  0x21   : > { %2344 = vmatprep.subr.bf16.mxu0 %v2511_v9 }
  0x22   : > { %2363 = vmatpush3.bf16.msra.mxu1 %v2520_v12 }
  0x23   : > { %2364 = vmatprep.subr.bf16.mxu1 %v2521_v15 }
  0x24   : > { %2345 = vmatpush3.bf16.msra.mxu0 %v2511_v9 }
  0x25   : > { %2346 = vmatprep.subr.bf16.mxu0 %v2512_v11 }
  0x26   : > { %2365 = vmatpush3.bf16.msra.mxu1 %v2521_v15 }
  0x27   : > { %2366 = vmatprep.subr.bf16.mxu1 %v2522_v16 }
  0x28   : > { %2347 = vmatpush3.bf16.msra.mxu0 %v2512_v11  ;;  %v2738_v11 = vld [vmem:[%s2856_s6 + $0x8] sm:$0xff]  }
  0x29   : > { %2348 = vmatprep.subr.bf16.mxu0 %v2513_v13  ;;  %v2157_v15 = vunpack.c.h.bf16 %v2738_v11 }
  0x2a   : > { %2367 = vmatpush3.bf16.msra.mxu1 %v2522_v16 }
  0x2b   : > { %2368 = vmatprep.subr.bf16.mxu1 %v2523_v17 }
  0x2c   : > { %2349 = vmatpush3.bf16.msra.mxu0 %v2513_v13  ;;  %v2743_v13 = vld [vmem:[%s2856_s6] sm:$0xff]  }
  0x2d   : > { %2374 = vmatprep.subr.bf16.mxu0 %v2524_v36 }
  0x2e   : > { %2369 = vmatpush3.bf16.msra.mxu1 %v2523_v17  ;;  %v2152_v17 = vunpack.c.l.bf16 %v2743_v13 }
  0x2f   : > { %2351 = vmatmul.mubr.bf16.vlgmr.msra.gmra.mxu0 %v2515_v14  ;;  %v2156_v14 = vunpack.c.l.bf16 %v2738_v11  ;;  %v2567_v11 = vld [vmem:[%s2731_s25 + $0x48] sm:$0xff]  }
  0x30   : > { %2375 = vmatpush3.bf16.msra.mxu0 %v2524_v36  ;;  %v2541_v36 = vld [vmem:[%s2731_s25 + $0x28] sm:$0xff]  }
  0x31   : > { %2376 = vmatprep.subr.bf16.mxu0 %v2525_v37 }
  0x34   : > { %2377 = vmatpush3.bf16.msra.mxu0 %v2525_v37  ;;  %v2544_v37 = vld [vmem:[%s2731_s25 + $0x30] sm:$0xff]  }
  0x35   : > { %2378 = vmatprep.subr.bf16.mxu0 %v2526_v54 }
  0x38   : > { %2379 = vmatpush3.bf16.msra.mxu0 %v2526_v54 }
  0x39   : > { %2380 = vmatprep.subr.bf16.mxu0 %v2527_v55 }
  0x3c   : > { %2381 = vmatpush3.bf16.msra.mxu0 %v2527_v55 }
  0x3d   : > { %2382 = vmatprep.subr.bf16.mxu0 %v2528_v56 }
  0x40   : > { %2383 = vmatpush3.bf16.msra.mxu0 %v2528_v56 }
  0x41   : > { %2384 = vmatprep.subr.bf16.mxu0 %v2529_v57 }
  0x44   : > { %2385 = vmatpush3.bf16.msra.mxu0 %v2529_v57 }
  0x45   : > { %2386 = vmatprep.subr.bf16.mxu0 %v2530_v58 }
  0x48   : > { %2387 = vmatpush3.bf16.msra.mxu0 %v2530_v58 }
  0x49   : > { %2388 = vmatprep.subr.bf16.mxu0 %v2531_v59 }
  0x4c   : > { %2389 = vmatpush3.bf16.msra.mxu0 %v2531_v59 }
  0xef   : > { %v2352_v18 = vpop.f32.mrf.mxu0 }
  0xf0   : > { %v600_v29 = vmul.f32 %v2352_v18, %v439_v24  ;;  %v2153_v18 = vunpack.c.h.bf16 %v2743_v13  ;;  %v2569_v13 = vld [vmem:[%s2731_s25 + $0x58] sm:$0xff]  }
  0xf1   : > { %v583_v19 = vpop.f32.mrf.mxu0 }
  0xf2   : > { %v598_v27 = vmul.f32 %v583_v19, %v437_v21 }
  0xf3   : > { %v2353_v22 = vpop.f32.mrf.mxu0 }
  0xf4   : > { %v601_v25 = vmul.f32 %v2353_v22, %v440_v20 }
  0xf5   : > { %v586_v26 = vpop.f32.mrf.mxu0 }
  0xf6   : > { %v599_v28 = vmul.f32 %v586_v26, %v438_v23  ;;  %v603_v31 = vpack.c.bf16 %v601_v25, %v600_v29  ;;  %v2536_v29 = vld [vmem:[%s2731_s25 + $0x10] sm:$0xff]  }
  0xf8   : > { %v602_v30 = vpack.c.bf16 %v599_v28, %v598_v27  ;;  %v2534_v27 = vld [vmem:[%s2671_s30 + $0x78] sm:$0xff]   ;;  %v2533_v28 = vld [vmem:[%s2731_s25 + $0x8] sm:$0xff]  }
  0xfa   : > { %2370 = vmatprep.mubr.bf16.mxu1 %v602_v30  ;;  %v2535_v30 = vld [vmem:[%s2671_s30 + $0x70] sm:$0xff]  }
  0xfb   : > { %2371 = vmatmul.mubr.bf16.vlgmr.msra.gmra.mxu1 %v603_v31  ;;  %v2538_v31 = vld [vmem:[%s2671_s30 + $0x68] sm:$0xff]  }
  0xfc   : > { %2398 = vmatprep.mubr.msk.bf16.mxu1 %vm886_vm0, %v2532_v10 }
 0x1bb   : > { %v2372_v32 = vpop.f32.mrf.mxu1 }
 0x1bc   : > { %705 = vmax.xlane.f32.xlu1 %v2372_v32 }
 0x1bd   : > { %v686_v33 = vpop.f32.mrf.mxu1 }
 0x1be   : > { %701 = vmax.xlane.f32.xlu0 %v686_v33 }
 0x1bf   : > { %v2373_v34 = vpop.f32.mrf.mxu1 }
 0x1c0   : > { %707 = vmax.xlane.f32.xlu1 %v2373_v34 }
 0x1c1   : > { %v689_v35 = vpop.f32.mrf.mxu1 }
 0x1c2   : > { %703 = vmax.xlane.f32.xlu0 %v689_v35 }
 0x245   : > { %v706_v38 = vpop.xlane.xlu1 %705 }
 0x246   : > { %v711_v39 = vsub.f32 %v2372_v32, %v706_v38  ;;  %v2537_v32 = vld [vmem:[%s2731_s25 + $0x18] sm:$0xff]   ;;  %v2543_v38 = vld [vmem:[%s2671_s30 + $0x50] sm:$0xff]  }
 0x247   : > { %v702_v40 = vpop.xlane.xlu0 %701 }
 0x248   : > { %v709_v41 = vsub.f32 %v686_v33, %v702_v40  ;;  %v717_v44 = vmul.f32 1.442695, %v711_v39  ;;  %v2540_v33 = vld [vmem:[%s2731_s25 + $0x20] sm:$0xff]   ;;  %v2546_v39 = vld [vmem:[%s2671_s30 + $0x48] sm:$0xff]   ;;  %v2545_v40 = vld [vmem:[%s2731_s25 + $0x38] sm:$0xff]  }
 0x249   : > { %v708_v42 = vpop.xlane.xlu1 %707 }
 0x24a   : > { %v713_v43 = vmul.f32 1.442695, %v709_v41  ;;  %v712_v46 = vsub.f32 %v2373_v34, %v708_v42  ;;  %v2539_v34 = vld [vmem:[%s2671_s30 + $0x60] sm:$0xff]   ;;  %v2548_v41 = vld [vmem:[%s2680_s11 + $0x10] sm:$0xff]  }
 0x24b   : > { %v704_v45 = vpop.xlane.xlu0 %703  ;;  %v2547_v42 = vld [vmem:[%s2671_s30 + $0x40] sm:$0xff]  }
 0x24c   : > { %2574 = vpow2.f32 %v713_v43  ;;  %v710_v47 = vsub.f32 %v689_v35, %v704_v45  ;;  %v719_v49 = vmul.f32 1.442695, %v712_v46  ;;  %v2542_v35 = vld [vmem:[%s2671_s30 + $0x58] sm:$0xff]   ;;  %v2551_v45 = vld [vmem:[%s2687_s14 + $0x70] sm:$0xff]   ;;  %v2552_v46 = vld [vmem:[%s2687_s14 + $0x68] sm:$0xff]  }
 0x24d   : > { %2576 = vpow2.f32 %v717_v44  ;;  %v2549_v43 = vld [vmem:[%s2680_s11 + $0x18] sm:$0xff]  }
 0x24e   : > { %v715_v48 = vmul.f32 1.442695, %v710_v47  ;;  %v2550_v44 = vld [vmem:[%s2687_s14 + $0x78] sm:$0xff]   ;;  %v2553_v47 = vld [vmem:[%s2687_s14 + $0x60] sm:$0xff]  }
 0x24f   : > { %2434 = vmatprep.subr.bf16.mxu0 %v2550_v44 }
 0x250   : > { %2578 = vpow2.f32 %v715_v48  ;;  %v2554_v48 = vld [vmem:[%s2687_s14 + $0x58] sm:$0xff]  }
 0x251   : > { %2580 = vpow2.f32 %v719_v49  ;;  %v2555_v49 = vld [vmem:[%s2687_s14 + $0x50] sm:$0xff]  }
 0x259   : > { %v2575_v50 = vpop.eup %2574 }
 0x25a   : > { %721 = vadd.xlane.f32.xlu0 %v2575_v50  ;;  %v2577_v51 = vpop.eup %2576 }
 0x25d   : > { %v2579_v52 = vpop.eup %2578 }
 0x25e   : > { %725 = vadd.xlane.f32.xlu0 %v2577_v51  ;;  %723 = vadd.xlane.f32.xlu1 %v2579_v52  ;;  %v2581_v53 = vpop.eup %2580 }
 0x262   : > { %727 = vadd.xlane.f32.xlu1 %v2581_v53 }
 0x2e3   : > { %v722_v60 = vpop.xlane.xlu0 %721 }
 0x2e4   : > { %2582 = vrcp.f32 %v722_v60 }
 0x2e7   : > { %v724_v61 = vpop.xlane.xlu1 %723  ;;  %v726_v62 = vpop.xlane.xlu0 %725 }
 0x2e8   : > { %2584 = vrcp.f32 %v724_v61 }
 0x2e9   : > { %2586 = vrcp.f32 %v726_v62 }
 0x2eb   : > { %v728_v63 = vpop.xlane.xlu1 %727 }
 0x2ec   : > { %2588 = vrcp.f32 %v728_v63 }
 0x2f1   : > { %v2583_v0 = vpop.eup %2582 }
 0x2f2   : > { %v733_v2 = vmul.f32 %v2583_v0, %v2575_v50  ;;  %v2556_v50 = vld [vmem:[%s2687_s14 + $0x48] sm:$0xff]  }
 0x2f5   : > { %v2585_v1 = vpop.eup %2584 }
 0x2f6   : > { %v734_v3 = vmul.f32 %v2585_v1, %v2579_v52  ;;  %v2587_v4 = vpop.eup %2586 }
 0x2f7   : > { %v735_v7 = vmul.f32 %v2587_v4, %v2577_v51  ;;  %v2557_v51 = vld [vmem:[%s2687_s14 + $0x40] sm:$0xff]  }
 0x2f8   : > { %v737_v5 = vpack.c.bf16 %v734_v3, %v733_v2 }
 0x2f9   : > { %v2589_v6 = vpop.eup %2588 }
 0x2fa   : > { %2390 = vmatprep.mubr.bf16.mxu0 %v737_v5  ;;  %v736_v8 = vmul.f32 %v2589_v6, %v2581_v53 }
 0x2fc   : > { %v738_v9 = vpack.c.bf16 %v736_v8, %v735_v7 }
 0x2fe   : > { %2391 = vmatmul.mubr.bf16.vlgmr.msra.gmra.mxu0 %v738_v9 }
 0x2ff   : > { %2435 = vmatpush3.bf16.msra.mxu0 %v2550_v44 }
 0x300   : > { %2436 = vmatprep.subr.bf16.mxu0 %v2551_v45 }
 0x303   : > { %2437 = vmatpush3.bf16.msra.mxu0 %v2551_v45 }
 0x304   : > { %2438 = vmatprep.subr.bf16.mxu0 %v2552_v46 }
 0x307   : > { %2439 = vmatpush3.bf16.msra.mxu0 %v2552_v46 }
 0x308   : > { %2440 = vmatprep.subr.bf16.mxu0 %v2553_v47 }
 0x30b   : > { %2441 = vmatpush3.bf16.msra.mxu0 %v2553_v47 }
 0x30c   : > { %2442 = vmatprep.subr.bf16.mxu0 %v2554_v48 }
 0x30f   : > { %2443 = vmatpush3.bf16.msra.mxu0 %v2554_v48 }
 0x310   : > { %2444 = vmatprep.subr.bf16.mxu0 %v2555_v49 }
 0x313   : > { %2445 = vmatpush3.bf16.msra.mxu0 %v2555_v49 }
 0x314   : > { %2446 = vmatprep.subr.bf16.mxu0 %v2556_v50 }
 0x317   : > { %2447 = vmatpush3.bf16.msra.mxu0 %v2556_v50 }
 0x318   : > { %2448 = vmatprep.subr.bf16.mxu0 %v2557_v51 }
 0x31b   : > { %2449 = vmatpush3.bf16.msra.mxu0 %v2557_v51 }
 0x3be   : > { %v2392_v12 = vpop.f32.mrf.mxu0 }
 0x3bf   : > { %v842_v20 = vmul.f32 %v2392_v12, %v2156_v14 }
 0x3c0   : > { %v821_v16 = vpop.f32.mrf.mxu0 }
 0x3c1   : > { %v840_v23 = vmul.f32 %v2152_v17, %v821_v16 }
 0x3c2   : > { %v2393_v19 = vpop.f32.mrf.mxu0 }
 0x3c3   : > { %v843_v21 = vmul.f32 %v2393_v19, %v2157_v15 }
 0x3c4   : > { %v824_v22 = vpop.f32.mrf.mxu0 }
 0x3c5   : > { %v845_v24 = vpack.c.bf16 %v843_v21, %v842_v20  ;;  %v841_v25 = vmul.f32 %v2153_v18, %v824_v22  ;;  %v1986_v20 = vld [vmem:[%s2707_s18 + $0x38] sm:$0xff]  ;;  %v1983_v21 = vld [vmem:[%s2707_s18 + $0x20] sm:$0xff] }
 0x3c7   : > { %v844_v26 = vpack.c.bf16 %v841_v25, %v840_v23  ;;  %2394 = vmatprep.subr.bf16.mxu1 %v845_v24  ;;  %v1984_v23 = vld [vmem:[%s2707_s18 + $0x28] sm:$0xff] }
 0x3c8   : > { %2395 = vmatpush3.bf16.msra.mxu1 %v845_v24  ;;  %v1985_v24 = vld [vmem:[%s2707_s18 + $0x30] sm:$0xff] }
 0x3c9   : > { %2396 = vmatprep.subr.bf16.mxu1 %v844_v26 }
 0x3cc   : > { %2397 = vmatpush3.bf16.msra.mxu1 %v844_v26 }
 0x3cd   : > { %2414 = vmatprep.subr.bf16.mxu1 %v2534_v27 }
 0x3cf   : > { %2399 = vmatmul.mubr.msk.bf16.vlgmr.msra.gmra.mxu1 %vm886_vm0, %v2533_v28 }
 0x3d0   : > { %2415 = vmatpush3.bf16.msra.mxu1 %v2534_v27  ;;  %2402 = vmatprep.mubr.msk.bf16.mxu1 %vm886_vm0, %v2536_v29 }
 0x3d1   : > { %2416 = vmatprep.subr.bf16.mxu1 %v2535_v30 }
 0x3d4   : > { %2417 = vmatpush3.bf16.msra.mxu1 %v2535_v30 }
 0x3d5   : > { %2418 = vmatprep.subr.bf16.mxu1 %v2538_v31 }
 0x3d7   : > { %2403 = vmatmul.mubr.msk.bf16.gmra.mxu1 %vm886_vm0, %v2537_v32 }
 0x3d8   : > { %2419 = vmatpush3.bf16.msra.mxu1 %v2538_v31  ;;  %2406 = vmatprep.mubr.msk.bf16.mxu1 %vm886_vm0, %v2540_v33 }
 0x3d9   : > { %2420 = vmatprep.subr.bf16.mxu1 %v2539_v34 }
 0x3dc   : > { %2421 = vmatpush3.bf16.msra.mxu1 %v2539_v34 }
 0x3dd   : > { %2422 = vmatprep.subr.bf16.mxu1 %v2542_v35 }
 0x3df   : > { %2407 = vmatmul.mubr.msk.bf16.gmra.mxu1 %vm886_vm0, %v2541_v36  ;;  %v2558_v36 = vld [vmem:[%s2717_s21 + $0x78] sm:$0xff]  }
 0x3e0   : > { %2423 = vmatpush3.bf16.msra.mxu1 %v2542_v35  ;;  %2410 = vmatprep.mubr.msk.bf16.mxu1 %vm886_vm0, %v2544_v37  ;;  %v2559_v37 = vld [vmem:[%s2717_s21 + $0x70] sm:$0xff]  }
 0x3e1   : > { %2424 = vmatprep.subr.bf16.mxu1 %v2543_v38 }
 0x3e4   : > { %2425 = vmatpush3.bf16.msra.mxu1 %v2543_v38 }
 0x3e5   : > { %2426 = vmatprep.subr.bf16.mxu1 %v2546_v39 }
 0x3e7   : > { %2411 = vmatmul.mubr.msk.bf16.gmra.mxu1 %vm886_vm0, %v2545_v40 }
 0x3e8   : > { %2427 = vmatpush3.bf16.msra.mxu1 %v2546_v39  ;;  %2430 = vmatprep.mubr.bf16.mxu1 %v2548_v41 }
 0x3e9   : > { %2428 = vmatprep.subr.bf16.mxu1 %v2547_v42 }
 0x3ec   : > { %2429 = vmatpush3.bf16.msra.mxu1 %v2547_v42 }
 0x3ed   : > { %2454 = vmatprep.subr.bf16.mxu1 %v2558_v36 }
 0x3ef   : > { %2431 = vmatmul.mubr.bf16.vlgmr.msra.gmra.mxu1 %v2549_v43 }
 0x3f0   : > { %2455 = vmatpush3.bf16.msra.mxu1 %v2558_v36 }
 0x3f1   : > { %2456 = vmatprep.subr.bf16.mxu1 %v2559_v37 }
 0x3f4   : > { %2457 = vmatpush3.bf16.msra.mxu1 %v2559_v37 }
 0x48f   : > { %v2400_v52 = vpop.f32.mrf.mxu1 }
 0x491   : > { %v945_v53 = vpop.f32.mrf.mxu1 }
 0x493   : > { %v2401_v54 = vpop.f32.mrf.mxu1 }
 0x494   : > { %v2166_v55 = vpack.c.bf16 %v2401_v54, %v2400_v52  ;;  %v2560_v54 = vld [vmem:[%s2717_s21 + $0x68] sm:$0xff]  }
 0x495   : > { %v948_v56 = vpop.f32.mrf.mxu1  ;;  %2458 = vmatprep.subr.bf16.mxu1 %v2560_v54 }
 0x496   : > { %2239 = vst [vmem:[%s2793_s10 + $0x8] sm:$0xff] %v2166_v55   ;;  %v2161_v57 = vpack.c.bf16 %v948_v56, %v945_v53  ;;  %2459 = vmatpush3.bf16.msra.mxu1 %v2560_v54  ;;  %v2561_v55 = vld [vmem:[%s2717_s21 + $0x60] sm:$0xff]   ;;  %v2562_v56 = vld [vmem:[%s2717_s21 + $0x58] sm:$0xff]  }
 0x497   : > { %v2404_v58 = vpop.f32.mrf.mxu1  ;;  %2460 = vmatprep.subr.bf16.mxu1 %v2561_v55 }
 0x498   : > { %2162 = vst [vmem:[%s2793_s10] sm:$0xff] %v2161_v57   ;;  %v2563_v57 = vld [vmem:[%s2717_s21 + $0x50] sm:$0xff]  }
 0x499   : > { %v961_v59 = vpop.f32.mrf.mxu1 }
 0x49a   : > { %2461 = vmatpush3.bf16.msra.mxu1 %v2561_v55 }
 0x49b   : > { %v2405_v60 = vpop.f32.mrf.mxu1  ;;  %2462 = vmatprep.subr.bf16.mxu1 %v2562_v56 }
 0x49c   : > { %v2176_v61 = vpack.c.bf16 %v2405_v60, %v2404_v58  ;;  %v2564_v58 = vld [vmem:[%s2717_s21 + $0x48] sm:$0xff]  }
 0x49d   : > { %v964_v62 = vpop.f32.mrf.mxu1 }
 0x49e   : > { %2241 = vst [vmem:[%s2793_s10 + $0x18] sm:$0xff] %v2176_v61   ;;  %v2171_v63 = vpack.c.bf16 %v964_v62, %v961_v59  ;;  %2463 = vmatpush3.bf16.msra.mxu1 %v2562_v56  ;;  %v2565_v59 = vld [vmem:[%s2717_s21 + $0x40] sm:$0xff]  }
 0x49f   : > { %v2408_v0 = vpop.f32.mrf.mxu1  ;;  %2464 = vmatprep.subr.bf16.mxu1 %v2563_v57 }
 0x4a0   : > { %2240 = vst [vmem:[%s2793_s10 + $0x10] sm:$0xff] %v2171_v63  }
 0x4a1   : > { %v977_v1 = vpop.f32.mrf.mxu1 }
 0x4a2   : > { %2465 = vmatpush3.bf16.msra.mxu1 %v2563_v57 }
 0x4a3   : > { %v2409_v2 = vpop.f32.mrf.mxu1  ;;  %2466 = vmatprep.subr.bf16.mxu1 %v2564_v58 }
 0x4a4   : > { %v2186_v3 = vpack.c.bf16 %v2409_v2, %v2408_v0 }
 0x4a5   : > { %v980_v4 = vpop.f32.mrf.mxu1 }
 0x4a6   : > { %2243 = vst [vmem:[%s2793_s10 + $0x28] sm:$0xff] %v2186_v3   ;;  %v2181_v5 = vpack.c.bf16 %v980_v4, %v977_v1  ;;  %2467 = vmatpush3.bf16.msra.mxu1 %v2564_v58 }
 0x4a7   : > { %v2412_v6 = vpop.f32.mrf.mxu1  ;;  %2468 = vmatprep.subr.bf16.mxu1 %v2565_v59 }
 0x4a8   : > { %2242 = vst [vmem:[%s2793_s10 + $0x20] sm:$0xff] %v2181_v5  }
 0x4a9   : > { %v993_v7 = vpop.f32.mrf.mxu1 }
 0x4aa   : > { %2469 = vmatpush3.bf16.msra.mxu1 %v2565_v59 }
 0x4ab   : > { %v2413_v8 = vpop.f32.mrf.mxu1 }
 0x4ac   : > { %v2196_v9 = vpack.c.bf16 %v2413_v8, %v2412_v6 }
 0x4ad   : > { %v996_v10 = vpop.f32.mrf.mxu1 }
 0x4ae   : > { %2245 = vst [vmem:[%s2793_s10 + $0x38] sm:$0xff] %v2196_v9   ;;  %v2191_v12 = vpack.c.bf16 %v996_v10, %v993_v7  ;;  %v2566_v10 = vld [vmem:[%s2731_s25 + $0x40] sm:$0xff]  }
 0x4af   : > { %v2432_v16 = vpop.f32.mrf.mxu1 }
 0x4b0   : > { %2244 = vst [vmem:[%s2793_s10 + $0x30] sm:$0xff] %v2191_v12   ;;  %v1277_v29 = vmul.f32 %v2432_v16, %v1985_v24  ;;  %v2570_v12 = vld [vmem:[%s2731_s25 + $0x70] sm:$0xff]  }
 0x4b1   : > { %v1260_v19 = vpop.f32.mrf.mxu1 }
 0x4b2   : > { %v1275_v27 = vmul.f32 %v1983_v21, %v1260_v19 }
 0x4b3   : > { %v2433_v22 = vpop.f32.mrf.mxu1 }
 0x4b4   : > { %v1278_v25 = vmul.f32 %v2433_v22, %v1986_v20 }
 0x4b5   : > { %v1263_v26 = vpop.f32.mrf.mxu1 }
 0x4b6   : > { %v1276_v28 = vmul.f32 %v1984_v23, %v1263_v26  ;;  %v1280_v31 = vpack.c.bf16 %v1278_v25, %v1277_v29 }
 0x4b8   : > { %v1279_v30 = vpack.c.bf16 %v1276_v28, %v1275_v27 }
 0x4ba   : > { %2450 = vmatprep.mubr.bf16.mxu0 %v1279_v30 }
 0x4bb   : > { %2451 = vmatmul.mubr.bf16.vlgmr.msra.gmra.mxu0 %v1280_v31 }
 0x4bc   : > { %2478 = vmatprep.mubr.msk.bf16.mxu0 %vm886_vm0, %v2566_v10 }
 0x57b   : > { %v2452_v32 = vpop.f32.mrf.mxu0 }
 0x57d   : > { %v1363_v33 = vpop.f32.mrf.mxu0 }
 0x57e   : > { %1378 = vmax.xlane.f32.xlu0 %v1363_v33 }
 0x57f   : > { %v2453_v34 = vpop.f32.mrf.mxu0 }
 0x581   : > { %v1366_v35 = vpop.f32.mrf.mxu0 }
 0x582   : > { %1382 = vmax.xlane.f32.xlu0 %v2452_v32  ;;  %1380 = vmax.xlane.f32.xlu1 %v1366_v35 }
 0x586   : > { %1384 = vmax.xlane.f32.xlu1 %v2453_v34 }
 0x607   : > { %v1379_v38 = vpop.xlane.xlu0 %1378 }
 0x608   : > { %v1386_v39 = vsub.f32 %v1363_v33, %v1379_v38 }
 0x60a   : > { %v1390_v40 = vmul.f32 1.442695, %v1386_v39 }
 0x60b   : > { %v1383_v41 = vpop.xlane.xlu0 %1382  ;;  %v1381_v42 = vpop.xlane.xlu1 %1380 }
 0x60c   : > { %2590 = vpow2.f32 %v1390_v40  ;;  %v1388_v43 = vsub.f32 %v2452_v32, %v1383_v41  ;;  %v1387_v44 = vsub.f32 %v1366_v35, %v1381_v42 }
 0x60e   : > { %v1394_v45 = vmul.f32 1.442695, %v1388_v43  ;;  %v1392_v46 = vmul.f32 1.442695, %v1387_v44 }
 0x60f   : > { %v1385_v47 = vpop.xlane.xlu1 %1384 }
 0x610   : > { %2592 = vpow2.f32 %v1394_v45  ;;  %v1389_v48 = vsub.f32 %v2453_v34, %v1385_v47 }
 0x611   : > { %2594 = vpow2.f32 %v1392_v46 }
 0x612   : > { %v1396_v49 = vmul.f32 1.442695, %v1389_v48 }
 0x614   : > { %2596 = vpow2.f32 %v1396_v49 }
 0x619   : > { %v2591_v50 = vpop.eup %2590 }
 0x61a   : > { %1398 = vadd.xlane.f32.xlu0 %v2591_v50 }
 0x61d   : > { %v2593_v51 = vpop.eup %2592 }
 0x61e   : > { %v2595_v52 = vpop.eup %2594  ;;  %1402 = vadd.xlane.f32.xlu0 %v2593_v51 }
 0x61f   : > { %1400 = vadd.xlane.f32.xlu1 %v2595_v52 }
 0x621   : > { %v2597_v53 = vpop.eup %2596 }
 0x623   : > { %1404 = vadd.xlane.f32.xlu1 %v2597_v53 }
 0x6a3   : > { %v1399_v60 = vpop.xlane.xlu0 %1398 }
 0x6a4   : > { %2598 = vrcp.f32 %v1399_v60 }
 0x6a7   : > { %v1403_v61 = vpop.xlane.xlu0 %1402 }
 0x6a8   : > { %v1401_v62 = vpop.xlane.xlu1 %1400 }
 0x6a9   : > { %2600 = vrcp.f32 %v1401_v62 }
 0x6aa   : > { %2602 = vrcp.f32 %v1403_v61 }
 0x6ac   : > { %v1405_v63 = vpop.xlane.xlu1 %1404 }
 0x6ad   : > { %2604 = vrcp.f32 %v1405_v63 }
 0x6b1   : > { %v2599_v0 = vpop.eup %2598 }
 0x6b2   : > { %v1410_v2 = vmul.f32 %v2599_v0, %v2591_v50 }
 0x6b6   : > { %v2601_v1 = vpop.eup %2600 }
 0x6b7   : > { %v1411_v3 = vmul.f32 %v2601_v1, %v2595_v52  ;;  %v2603_v4 = vpop.eup %2602 }
 0x6b8   : > { %v1412_v7 = vmul.f32 %v2603_v4, %v2593_v51 }
 0x6b9   : > { %v1414_v5 = vpack.c.bf16 %v1411_v3, %v1410_v2 }
 0x6ba   : > { %v2605_v6 = vpop.eup %2604 }
 0x6bb   : > { %2470 = vmatprep.mubr.bf16.mxu1 %v1414_v5  ;;  %v1413_v8 = vmul.f32 %v2605_v6, %v2597_v53 }
 0x6bd   : > { %v1415_v9 = vpack.c.bf16 %v1413_v8, %v1412_v7 }
 0x6bf   : > { %2471 = vmatmul.mubr.bf16.vlgmr.msra.gmra.mxu1 %v1415_v9 }
 0x6c0   : > { %2490 = vmatprep.mubr.msk.bf16.mxu1 %vm886_vm0, %v2570_v12 }
 0x77f   : > { %v2472_v16 = vpop.f32.mrf.mxu1 }
 0x780   : > { %v1515_v21 = vmul.f32 %v2472_v16, %v2156_v14  ;;  %v2571_v14 = vld [vmem:[%s2731_s25 + $0x78] sm:$0xff]  }
 0x781   : > { %v1498_v19 = vpop.f32.mrf.mxu1 }
 0x782   : > { %v1513_v24 = vmul.f32 %v2152_v17, %v1498_v19  ;;  %v2572_v17 = vld [vmem:[%s2731_s25 + $0x60] sm:$0xff]  }
 0x783   : > { %v2473_v20 = vpop.f32.mrf.mxu1 }
 0x784   : > { %v1516_v22 = vmul.f32 %v2473_v20, %v2157_v15  ;;  %v2568_v15 = vld [vmem:[%s2731_s25 + $0x50] sm:$0xff]  }
 0x785   : > { %v1501_v23 = vpop.f32.mrf.mxu1 }
 0x786   : > { %v1518_v25 = vpack.c.bf16 %v1516_v22, %v1515_v21  ;;  %v1514_v26 = vmul.f32 %v2153_v18, %v1501_v23  ;;  %v2573_v18 = vld [vmem:[%s2731_s25 + $0x68] sm:$0xff]  }
 0x788   : > { %v1517_v27 = vpack.c.bf16 %v1514_v26, %v1513_v24  ;;  %2474 = vmatprep.subr.bf16.mxu0 %v1518_v25  ;;  %2494 = vmatprep.subr.bf16.mxu1 %v1518_v25 }
 0x789   : > { %2475 = vmatpush3.bf16.msra.mxu0 %v1518_v25  ;;  %2496 = vmatpush3.bf16.msra.mxu1 %v1518_v25 }
 0x78a   : > { %2476 = vmatprep.subr.bf16.mxu0 %v1517_v27  ;;  %2495 = vmatprep.subr.bf16.mxu1 %v1517_v27 }
 0x78d   : > { %2477 = vmatpush3.bf16.msra.mxu0 %v1517_v27  ;;  %2497 = vmatpush3.bf16.msra.mxu1 %v1517_v27 }
 0x790   : > { %2479 = vmatmul.mubr.msk.bf16.vlgmr.msra.gmra.mxu0 %vm886_vm0, %v2567_v11  ;;  %2491 = vmatmul.mubr.msk.bf16.vlgmr.msra.gmra.mxu1 %vm886_vm0, %v2571_v14 }
 0x791   : > { %2482 = vmatprep.mubr.msk.bf16.mxu0 %vm886_vm0, %v2568_v15 }
 0x798   : > { %2483 = vmatmul.mubr.msk.bf16.gmra.mxu0 %vm886_vm0, %v2569_v13 }
 0x799   : > { %2486 = vmatprep.mubr.msk.bf16.mxu0 %vm886_vm0, %v2572_v17 }
 0x7a0   : > { %2487 = vmatmul.mubr.msk.bf16.gmra.mxu0 %vm886_vm0, %v2573_v18 }
 0x850   : > { %v2480_v28 = vpop.f32.mrf.mxu0  ;;  %v2492_v29 = vpop.f32.mrf.mxu1 }
 0x852   : > { %v1617_v30 = vpop.f32.mrf.mxu0  ;;  %v1665_v31 = vpop.f32.mrf.mxu1 }
 0x854   : > { %v2481_v32 = vpop.f32.mrf.mxu0  ;;  %v2493_v33 = vpop.f32.mrf.mxu1 }
 0x855   : > { %v2206_v34 = vpack.c.bf16 %v2481_v32, %v2480_v28  ;;  %v2236_v35 = vpack.c.bf16 %v2493_v33, %v2492_v29 }
 0x856   : > { %v1620_v36 = vpop.f32.mrf.mxu0  ;;  %v1668_v37 = vpop.f32.mrf.mxu1 }
 0x857   : > { %2247 = vst [vmem:[%s2793_s10 + $0x48] sm:$0xff] %v2206_v34   ;;  %v2201_v38 = vpack.c.bf16 %v1620_v36, %v1617_v30  ;;  %2253 = vst [vmem:[%s2793_s10 + $0x78] sm:$0xff] %v2236_v35   ;;  %v2231_v39 = vpack.c.bf16 %v1668_v37, %v1665_v31 }
 0x858   : > { %v2484_v40 = vpop.f32.mrf.mxu0 }
 0x859   : > { %2246 = vst [vmem:[%s2793_s10 + $0x40] sm:$0xff] %v2201_v38   ;;  %2252 = vst [vmem:[%s2793_s10 + $0x70] sm:$0xff] %v2231_v39  }
 0x85a   : > { %v1633_v41 = vpop.f32.mrf.mxu0 }
 0x85c   : > { %v2485_v42 = vpop.f32.mrf.mxu0 }
 0x85d   : > { %v2216_v43 = vpack.c.bf16 %v2485_v42, %v2484_v40 }
 0x85e   : > { %v1636_v44 = vpop.f32.mrf.mxu0 }
 0x85f   : > { %2249 = vst [vmem:[%s2793_s10 + $0x58] sm:$0xff] %v2216_v43   ;;  %v2211_v45 = vpack.c.bf16 %v1636_v44, %v1633_v41 }
 0x860   : > { %v2488_v46 = vpop.f32.mrf.mxu0 }
 0x861   : > { %2248 = vst [vmem:[%s2793_s10 + $0x50] sm:$0xff] %v2211_v45  }
 0x862   : > { %v1649_v47 = vpop.f32.mrf.mxu0 }
 0x864   : > { %v2489_v48 = vpop.f32.mrf.mxu0 }
 0x865   : > { %v2226_v49 = vpack.c.bf16 %v2489_v48, %v2488_v46 }
 0x866   : > { %v1652_v50 = vpop.f32.mrf.mxu0 }
 0x867   : > { %2251 = vst [vmem:[%s2793_s10 + $0x68] sm:$0xff] %v2226_v49   ;;  %v2221_v51 = vpack.c.bf16 %v1652_v50, %v1649_v47 }
 0x869   : > { %2250 = vst [vmem:[%s2793_s10 + $0x60] sm:$0xff] %v2221_v51  }
 0x86a PF: > { %s17_s24 = sadd.s32 1, %s2612_s24  }
 0x86b   : > { %p14_p4 = scmp.ge.s32.totalorder %s17_s24, 4  }
 0x86d   :  { %16 = sbr.rel (!%p14_p4) target bundleno = 1 (0x1), region = 100 }

</bundles_post_ra>
